<compile_context>
chip_gen: v7x
topology: tpu7x:2x2x1
jax: 0.10.0
libtpu: 0.0.40
codegen_flags: <defaults>
</compile_context>

<pallas_src>
import functools

import numpy as np
import jax
import jax.numpy as jnp
from jax import lax
from jax.experimental import pallas as pl
from jax.experimental.pallas import tpu as pltpu


# ----------------------------- Pallas kernel ------------------------------- #
def _quadruplet_kernel(alphas_ref, a_ref, p_ref, n_ref, f_ref, o_ref,
                       acc_ref, dap_ref, *, inv_n, inv_n2, cross_term_dtype):
    i = pl.program_id(0)
    j = pl.program_id(1)

    @pl.when(jnp.logical_and(i == 0, j == 0))
    def _init():
        acc_ref[...] = jnp.zeros_like(acc_ref)

    alpha1 = alphas_ref[0]   # SMEM scalar
    alpha2 = alphas_ref[1]   # SMEM scalar

    n = n_ref[...]           # (TI, Dp) f32  negatives (row tile)
    f = f_ref[...]           # (TJ, Dp) f32  fourth negatives (col tile)

    # Once per i-tile (j == 0): anchor-positive / anchor-negative distances and
    # the triplet term.  d_ap is cached in VMEM scratch for reuse across j-tiles.
    @pl.when(j == 0)
    def _row_block():
        a = a_ref[...]
        p = p_ref[...]
        d_ap = jnp.sqrt(jnp.sum((a - p) * (a - p), axis=-1, keepdims=True))   # (TI, 1)
        d_an = jnp.sqrt(jnp.sum((a - n) * (a - n), axis=-1, keepdims=True))   # (TI, 1)
        dap_ref[...] = d_ap
        trip = jnp.maximum(d_ap - d_an + alpha1, 0.0)                          # (TI, 1)
        acc_ref[...] += jnp.sum(trip, keepdims=True) * inv_n

    d_ap = dap_ref[...]      # (TI, 1), valid for every j of this i-tile

    # Pairwise ||n_i - f_j|| via the Gram identity — dominant work on the MXU.
    if cross_term_dtype is not None:       # optional bf16 cross-term (v6e/v7x)
        n_mm = n.astype(cross_term_dtype)
        f_mm = f.astype(cross_term_dtype)
    else:
        n_mm, f_mm = n, f
    g = lax.dot_general(n_mm, f_mm, (((1,), (1,)), ((), ())),
                        preferred_element_type=jnp.float32)                    # (TI, TJ)

    n_sq = jnp.sum(n * n, axis=-1, keepdims=True)                              # (TI, 1)
    ones_row = jnp.ones((1, f.shape[-1]), dtype=jnp.float32)
    f_sq_row = lax.dot_general(ones_row, f * f, (((1,), (1,)), ((), ())),
                               preferred_element_type=jnp.float32)             # (1, TJ)

    # Clamp: rounding in the Gram form can produce tiny negatives -> NaN in sqrt.
    d_nf2 = jnp.maximum(n_sq + f_sq_row - 2.0 * g, 0.0)
    d_nf = jnp.sqrt(d_nf2)                                                     # (TI, TJ)
    # TODO(synk): add an eps inside the sqrt / custom VJP if this kernel is ever differentiated.

    quad = jnp.maximum(d_ap - d_nf + alpha2, 0.0)                              # (TI, TJ)
    acc_ref[...] += jnp.sum(quad, keepdims=True) * inv_n2

    # Output block index is constant across the grid -> written back once at the end.
    o_ref[...] = acc_ref[...].astype(o_ref.dtype)


def _pick_tile(n):
    """Largest nice tile that divides n; fall back to full extent for small/ragged N."""
    for t in (256, 128):
        if n % t == 0:
            return t
    return n


def quadruplet_loss_pallas(a_e, p_e, n_e, f_e, alpha1, alpha2, cross_term_dtype=None):
    a_e, p_e, n_e, f_e = (jnp.asarray(x, jnp.float32) for x in (a_e, p_e, n_e, f_e))
    n_trip, dim = a_e.shape

    # Lane-dense embedding dim: zero-padding is exact for L2 norms and dot products.
    dim_p = ((dim + 127) // 128) * 128
    if dim_p != dim:
        pad = ((0, 0), (0, dim_p - dim))
        a_e, p_e, n_e, f_e = (jnp.pad(x, pad) for x in (a_e, p_e, n_e, f_e))

    tile = _pick_tile(n_trip)
    grid = (n_trip // tile, n_trip // tile)

    alphas = jnp.array([alpha1, alpha2], dtype=jnp.float32)

    kernel = functools.partial(
        _quadruplet_kernel,
        inv_n=1.0 / n_trip,
        inv_n2=1.0 / (n_trip * n_trip),
        cross_term_dtype=cross_term_dtype,
    )

    # Rough VMEM need: 4 double-buffered input tiles + score tile + temps.
    # Only raise the scoped limit when the tiles actually demand it (keeps the
    # request well below v7x's 64 MiB physical VMEM).
    est_bytes = 4 * 2 * tile * dim_p * 4 + 4 * tile * tile * 4
    vmem_limit = None
    if est_bytes > 12 * 1024 * 1024:
        vmem_limit = int(min(max(2 * est_bytes, 32 * 1024 * 1024), 48 * 1024 * 1024))

    row_spec = pl.BlockSpec((tile, dim_p), lambda i, j: (i, 0))

    out = pl.pallas_call(
        kernel,
        out_shape=jax.ShapeDtypeStruct((1, 1), jnp.float32),
        grid=grid,
        in_specs=[
            pl.BlockSpec(memory_space=pltpu.MemorySpace.SMEM),       # alphas (2,)
            row_spec,                                                # anchors
            pl.BlockSpec((tile, dim_p), lambda i, j: (i, 0)),        # positives
            pl.BlockSpec((tile, dim_p), lambda i, j: (i, 0)),        # negatives
            pl.BlockSpec((tile, dim_p), lambda i, j: (j, 0)),        # fourth negatives
        ],
        out_specs=pl.BlockSpec((1, 1), lambda i, j: (0, 0)),
        scratch_shapes=[
            pltpu.VMEM((1, 1), jnp.float32),     # running trip/N + quad/N^2 sum
            pltpu.VMEM((tile, 1), jnp.float32),  # cached d_ap for the current i-tile
        ],
        compiler_params=pltpu.CompilerParams(
            # Both grid axes reduce into the single scalar accumulator.
            dimension_semantics=("arbitrary", "arbitrary"),
            vmem_limit_bytes=vmem_limit,
        ),
    )(alphas, a_e, p_e, n_e, f_e)
    return out[0, 0]


# ------------------------- host-side glue (miner) --------------------------- #
def random_triplet_miner(labels, rng):
    """Simple deterministic random batch-miner: (anchor, positive, negative) indices."""
    labels = np.asarray(labels)
    idx = np.arange(len(labels))
    triplets = []
    for i in range(len(labels)):
        pos_cand = idx[(labels == labels[i]) & (idx != i)]
        neg_cand = idx[labels != labels[i]]
        triplets.append((i, int(rng.choice(pos_cand)), int(rng.choice(neg_cand))))
    return triplets


class QuadrupletCriterion:
    """Mirrors criteria/quadruplet.py::Criterion.forward."""

    def __init__(self, margin_alpha_1=0.2, margin_alpha_2=0.2, seed=0):
        self.margin_alpha_1 = margin_alpha_1
        self.margin_alpha_2 = margin_alpha_2
        self.rng = np.random.RandomState(seed)
        self.batchminer = lambda batch, labels: random_triplet_miner(labels, self.rng)

    def __call__(self, batch, labels):
        sampled_triplets = self.batchminer(batch, labels)
        anchors = np.array([t[0] for t in sampled_triplets]).reshape(-1, 1)
        positives = np.array([t[1] for t in sampled_triplets]).reshape(-1, 1)
        negatives = np.array([t[2] for t in sampled_triplets]).reshape(-1, 1)

        fourth_mask = negatives != negatives.T
        fourth_negatives = []
        for idxs in fourth_mask:
            cand = np.arange(len(batch))[idxs]
            if cand.size == 0:  # degenerate case (all negatives identical); keep script runnable
                cand = np.arange(len(batch))
            fourth_negatives.append(int(self.rng.choice(cand)))
        fourth_negatives = np.array(fourth_negatives)

        # gather embeddings (glue in plain JAX)
        a_e = batch[anchors[:, 0], :]
        p_e = batch[positives[:, 0], :]
        n_e = batch[negatives[:, 0], :]
        f_e = batch[fourth_negatives, :]

        loss = quadruplet_loss_pallas(
            a_e, p_e, n_e, f_e, self.margin_alpha_1, self.margin_alpha_2
        )
        return loss, (a_e, p_e, n_e, f_e)


# ------------------------------ reference ----------------------------------- #
def reference_loss(a_e, p_e, n_e, f_e, a1, a2):
    d_ap = np.linalg.norm(a_e - p_e, axis=-1)                          # (N,)
    d_an = np.linalg.norm(a_e - n_e, axis=-1)                          # (N,)
    trip = np.maximum(d_ap - d_an + a1, 0.0)                           # (N,)
    d_nf = np.linalg.norm(n_e[:, None, :] - f_e[None, :, :], axis=-1)  # (N, N)
    quad = np.maximum(d_ap[:, None] - d_nf + a2, 0.0)                  # (N, N)
    return float(trip.mean() + quad.mean())


if __name__ == "__main__":
    BS, DIM = 8, 32
    key = jax.random.PRNGKey(0)
    batch = jax.random.normal(key, (BS, DIM), dtype=jnp.float32)
    labels = np.array([0, 0, 1, 1, 2, 2, 3, 3], dtype=np.int32)

    criterion = QuadrupletCriterion(margin_alpha_1=0.2, margin_alpha_2=0.2, seed=0)
    loss, (a_e, p_e, n_e, f_e) = criterion(batch, labels)
    loss = jax.block_until_ready(loss)

    ref = reference_loss(
        np.asarray(a_e), np.asarray(p_e), np.asarray(n_e), np.asarray(f_e), 0.2, 0.2
    )
    assert np.allclose(float(loss), ref, rtol=1e-4, atol=1e-5), (float(loss), ref)
    print("KERNEL_OK")
</pallas_src>

<mosaic_0001>
module attributes {stable_mosaic.version = 11 : i64} {
  func.func @_quadruplet_kernel(%arg0: i32, %arg1: i32, %arg2: memref<2xf32, #tpu.memory_space<smem>>, %arg3: memref<8x128xf32, #tpu.memory_space<vmem>>, %arg4: memref<8x128xf32, #tpu.memory_space<vmem>>, %arg5: memref<8x128xf32, #tpu.memory_space<vmem>>, %arg6: memref<8x128xf32, #tpu.memory_space<vmem>>, %arg7: memref<1x1xf32, #tpu.memory_space<vmem>>, %arg8: memref<1x1xf32, #tpu.memory_space<vmem>>, %arg9: memref<8x1xf32, #tpu.memory_space<vmem>>) attributes {dimension_semantics = [#tpu.dimension_semantics<arbitrary>, #tpu.dimension_semantics<arbitrary>], iteration_bounds = array<i64: 1, 1>, scalar_prefetch = 0 : i64, scratch_operands = 2 : i64, tpu.core_type = #tpu.core_type<tc>, window_params = [{transform_indices = @transform_0, window_bounds = array<i64: 2>}, {transform_indices = @transform_1, window_bounds = array<i64: 8, 128>}, {transform_indices = @transform_2, window_bounds = array<i64: 8, 128>}, {transform_indices = @transform_3, window_bounds = array<i64: 8, 128>}, {transform_indices = @transform_4, window_bounds = array<i64: 8, 128>}, {pipeline_mode = #tpu.pipeline_mode<synchronous>, transform_indices = @transform_5, window_bounds = array<i64: 1, 1>}]} {
    %c0_i32 = arith.constant 0 : i32
    %0 = arith.cmpi eq, %arg0, %c0_i32 : i32
    %c0_i32_0 = arith.constant 0 : i32
    %1 = arith.cmpi eq, %arg1, %c0_i32_0 : i32
    %2 = arith.andi %0, %1 : i1
    %3 = arith.extui %2 : i1 to i32
    %c0_i32_1 = arith.constant 0 : i32
    %4 = arith.cmpi ne, %3, %c0_i32_1 : i32
    scf.if %4 {
      %cst_26 = arith.constant 0.000000e+00 : f32
      %47 = vector.broadcast %cst_26 : f32 to vector<1x1xf32>
      %c0_27 = arith.constant 0 : index
      %c0_28 = arith.constant 0 : index
      %48 = vector.load %arg8[%c0_27, %c0_28] : memref<1x1xf32, #tpu.memory_space<vmem>>, vector<1x1xf32>
      tpu.vector_store %arg8[%c0_27, %c0_28], %47 {strides = array<i32>} : memref<1x1xf32, #tpu.memory_space<vmem>>, vector<1x1xf32>,
    } else {
    }
    %c0 = arith.constant 0 : index
    %5 = memref.load %arg2[%c0] : memref<2xf32, #tpu.memory_space<smem>>
    %c1 = arith.constant 1 : index
    %6 = memref.load %arg2[%c1] : memref<2xf32, #tpu.memory_space<smem>>
    %c0_2 = arith.constant 0 : index
    %c0_3 = arith.constant 0 : index
    %7 = vector.load %arg5[%c0_2, %c0_3] : memref<8x128xf32, #tpu.memory_space<vmem>>, vector<8x128xf32>
    %c0_4 = arith.constant 0 : index
    %c0_5 = arith.constant 0 : index
    %8 = vector.load %arg6[%c0_4, %c0_5] : memref<8x128xf32, #tpu.memory_space<vmem>>, vector<8x128xf32>
    %c0_i32_6 = arith.constant 0 : i32
    %9 = arith.cmpi eq, %arg1, %c0_i32_6 : i32
    %10 = arith.extui %9 : i1 to i32
    %c0_i32_7 = arith.constant 0 : i32
    %11 = arith.cmpi ne, %10, %c0_i32_7 : i32
    scf.if %11 {
      %c0_26 = arith.constant 0 : index
      %c0_27 = arith.constant 0 : index
      %47 = vector.load %arg3[%c0_26, %c0_27] : memref<8x128xf32, #tpu.memory_space<vmem>>, vector<8x128xf32>
      %c0_28 = arith.constant 0 : index
      %c0_29 = arith.constant 0 : index
      %48 = vector.load %arg4[%c0_28, %c0_29] : memref<8x128xf32, #tpu.memory_space<vmem>>, vector<8x128xf32>
      %49 = arith.subf %47, %48 : vector<8x128xf32>
      %50 = arith.subf %47, %48 : vector<8x128xf32>
      %51 = arith.mulf %49, %50 : vector<8x128xf32>
      %cst_30 = arith.constant dense<0.000000e+00> : vector<8xf32>
      %52 = vector.multi_reduction <add>, %51, %cst_30 [1] : vector<8x128xf32> to vector<8xf32>
      %53 = vector.shape_cast %52 : vector<8xf32> to vector<8x1xf32>
      %54 = math.sqrt %53 : vector<8x1xf32>
      %55 = arith.subf %47, %7 : vector<8x128xf32>
      %56 = arith.subf %47, %7 : vector<8x128xf32>
      %57 = arith.mulf %55, %56 : vector<8x128xf32>
      %cst_31 = arith.constant dense<0.000000e+00> : vector<8xf32>
      %58 = vector.multi_reduction <add>, %57, %cst_31 [1] : vector<8x128xf32> to vector<8xf32>
      %59 = vector.shape_cast %58 : vector<8xf32> to vector<8x1xf32>
      %60 = math.sqrt %59 : vector<8x1xf32>
      %c0_32 = arith.constant 0 : index
      %c0_33 = arith.constant 0 : index
      %61 = vector.load %arg9[%c0_32, %c0_33] : memref<8x1xf32, #tpu.memory_space<vmem>>, vector<8x1xf32>
      tpu.vector_store %arg9[%c0_32, %c0_33], %54 {strides = array<i32>} : memref<8x1xf32, #tpu.memory_space<vmem>>, vector<8x1xf32>,
      %62 = arith.subf %54, %60 : vector<8x1xf32>
      %63 = vector.broadcast %5 : f32 to vector<8x1xf32>
      %64 = arith.addf %62, %63 : vector<8x1xf32>
      %cst_34 = arith.constant 0.000000e+00 : f32
      %65 = vector.broadcast %cst_34 : f32 to vector<8x1xf32>
      %66 = arith.maximumf %64, %65 : vector<8x1xf32>
      %c0_35 = arith.constant 0 : index
      %c0_36 = arith.constant 0 : index
      %67 = vector.load %arg8[%c0_35, %c0_36] : memref<1x1xf32, #tpu.memory_space<vmem>>, vector<1x1xf32>
      %68 = vector.shape_cast %66 : vector<8x1xf32> to vector<1x8x1xf32>
      %cst_37 = arith.constant dense<0.000000e+00> : vector<1xf32>
      %69 = vector.multi_reduction <add>, %68, %cst_37 [1, 2] : vector<1x8x1xf32> to vector<1xf32>
      %70 = vector.shape_cast %69 : vector<1xf32> to vector<1x1x1xf32>
      %71 = vector.extract %70[0, 0, 0] : f32 from vector<1x1x1xf32>
      %72 = vector.broadcast %71 : f32 to vector<1x1xf32>
      %cst_38 = arith.constant 1.250000e-01 : f32
      %73 = vector.broadcast %cst_38 : f32 to vector<1x1xf32>
      %74 = arith.mulf %72, %73 : vector<1x1xf32>
      %75 = arith.addf %67, %74 : vector<1x1xf32>
      %c0_39 = arith.constant 0 : index
      %c0_40 = arith.constant 0 : index
      %76 = vector.load %arg8[%c0_39, %c0_40] : memref<1x1xf32, #tpu.memory_space<vmem>>, vector<1x1xf32>
      tpu.vector_store %arg8[%c0_39, %c0_40], %75 {strides = array<i32>} : memref<1x1xf32, #tpu.memory_space<vmem>>, vector<1x1xf32>,
    } else {
    }
    %c0_8 = arith.constant 0 : index
    %c0_9 = arith.constant 0 : index
    %12 = vector.load %arg9[%c0_8, %c0_9] : memref<8x1xf32, #tpu.memory_space<vmem>>, vector<8x1xf32>
    %cst = arith.constant dense<0.000000e+00> : vector<8x8xf32>
    %13 = tpu.matmul %7, %8, %cst {dimension_numbers = #tpu.dot_dimension_numbers<[1], [1], [0], [0], [0, 0, 1, 0], [], []>} : vector<8x128xf32>, vector<8x128xf32>, vector<8x8xf32> -> vector<8x8xf32>
    %14 = arith.mulf %7, %7 : vector<8x128xf32>
    %cst_10 = arith.constant dense<0.000000e+00> : vector<8xf32>
    %15 = vector.multi_reduction <add>, %14, %cst_10 [1] : vector<8x128xf32> to vector<8xf32>
    %16 = vector.shape_cast %15 : vector<8xf32> to vector<8x1xf32>
    %cst_11 = arith.constant 1.000000e+00 : f32
    %17 = vector.broadcast %cst_11 : f32 to vector<1x128xf32>
    %18 = arith.mulf %8, %8 : vector<8x128xf32>
    %cst_12 = arith.constant dense<0.000000e+00> : vector<1x8xf32>
    %19 = tpu.matmul %17, %18, %cst_12 {dimension_numbers = #tpu.dot_dimension_numbers<[1], [1], [0], [0], [0, 0, 1, 0], [], []>} : vector<1x128xf32>, vector<8x128xf32>, vector<1x8xf32> -> vector<1x8xf32>
    %20 = vector.broadcast %16 : vector<8x1xf32> to vector<8x8xf32>
    %21 = vector.broadcast %19 : vector<1x8xf32> to vector<8x8xf32>
    %22 = arith.addf %20, %21 : vector<8x8xf32>
    %cst_13 = arith.constant 2.000000e+00 : f32
    %23 = vector.broadcast %cst_13 : f32 to vector<8x8xf32>
    %24 = arith.mulf %23, %13 : vector<8x8xf32>
    %25 = arith.subf %22, %24 : vector<8x8xf32>
    %cst_14 = arith.constant 0.000000e+00 : f32
    %26 = vector.broadcast %cst_14 : f32 to vector<8x8xf32>
    %27 = arith.maximumf %25, %26 : vector<8x8xf32>
    %28 = math.sqrt %27 : vector<8x8xf32>
    %29 = vector.broadcast %12 : vector<8x1xf32> to vector<8x8xf32>
    %30 = arith.subf %29, %28 : vector<8x8xf32>
    %31 = vector.broadcast %6 : f32 to vector<8x8xf32>
    %32 = arith.addf %30, %31 : vector<8x8xf32>
    %cst_15 = arith.constant 0.000000e+00 : f32
    %33 = vector.broadcast %cst_15 : f32 to vector<8x8xf32>
    %34 = arith.maximumf %32, %33 : vector<8x8xf32>
    %c0_16 = arith.constant 0 : index
    %c0_17 = arith.constant 0 : index
    %35 = vector.load %arg8[%c0_16, %c0_17] : memref<1x1xf32, #tpu.memory_space<vmem>>, vector<1x1xf32>
    %36 = vector.shape_cast %34 : vector<8x8xf32> to vector<1x8x8xf32>
    %cst_18 = arith.constant dense<0.000000e+00> : vector<1xf32>
    %37 = vector.multi_reduction <add>, %36, %cst_18 [1, 2] : vector<1x8x8xf32> to vector<1xf32>
    %38 = vector.shape_cast %37 : vector<1xf32> to vector<1x1x1xf32>
    %39 = vector.extract %38[0, 0, 0] : f32 from vector<1x1x1xf32>
    %40 = vector.broadcast %39 : f32 to vector<1x1xf32>
    %cst_19 = arith.constant 1.562500e-02 : f32
    %41 = vector.broadcast %cst_19 : f32 to vector<1x1xf32>
    %42 = arith.mulf %40, %41 : vector<1x1xf32>
    %43 = arith.addf %35, %42 : vector<1x1xf32>
    %c0_20 = arith.constant 0 : index
    %c0_21 = arith.constant 0 : index
    %44 = vector.load %arg8[%c0_20, %c0_21] : memref<1x1xf32, #tpu.memory_space<vmem>>, vector<1x1xf32>
    tpu.vector_store %arg8[%c0_20, %c0_21], %43 {strides = array<i32>} : memref<1x1xf32, #tpu.memory_space<vmem>>, vector<1x1xf32>,
    %c0_22 = arith.constant 0 : index
    %c0_23 = arith.constant 0 : index
    %45 = vector.load %arg8[%c0_22, %c0_23] : memref<1x1xf32, #tpu.memory_space<vmem>>, vector<1x1xf32>
    %c0_24 = arith.constant 0 : index
    %c0_25 = arith.constant 0 : index
    %46 = vector.load %arg7[%c0_24, %c0_25] : memref<1x1xf32, #tpu.memory_space<vmem>>, vector<1x1xf32>
    tpu.vector_store %arg7[%c0_24, %c0_25], %45 {strides = array<i32>} : memref<1x1xf32, #tpu.memory_space<vmem>>, vector<1x1xf32>,
    return
  }
  func.func @transform_0(%arg0: i32, %arg1: i32) -> i32 {
    %c0_i32 = arith.constant 0 : i32
    %c0_i32_0 = arith.constant 0 : i32
    return %c0_i32 : i32
  }
  func.func @transform_1(%arg0: i32, %arg1: i32) -> (i32, i32) {
    %c0_i32 = arith.constant 0 : i32
    %c0_i32_0 = arith.constant 0 : i32
    return %arg0, %c0_i32 : i32, i32
  }
  func.func @transform_2(%arg0: i32, %arg1: i32) -> (i32, i32) {
    %c0_i32 = arith.constant 0 : i32
    %c0_i32_0 = arith.constant 0 : i32
    return %arg0, %c0_i32 : i32, i32
  }
  func.func @transform_3(%arg0: i32, %arg1: i32) -> (i32, i32) {
    %c0_i32 = arith.constant 0 : i32
    %c0_i32_0 = arith.constant 0 : i32
    return %arg0, %c0_i32 : i32, i32
  }
  func.func @transform_4(%arg0: i32, %arg1: i32) -> (i32, i32) {
    %c0_i32 = arith.constant 0 : i32
    %c0_i32_0 = arith.constant 0 : i32
    return %arg1, %c0_i32 : i32, i32
  }
  func.func @transform_5(%arg0: i32, %arg1: i32) -> (i32, i32) {
    %c0_i32 = arith.constant 0 : i32
    %c0_i32_0 = arith.constant 0 : i32
    %c0_i32_1 = arith.constant 0 : i32
    return %c0_i32, %c0_i32_0 : i32, i32
  }
}

</mosaic_0001>

<bundles_post_ra>
// kernel: tpu_custom_call.1
= control target key start
LH: loop header
LB: loop body
LE: loop exit
PB: predicated region body
PF: predicated region fallthrough
CT: control target
= control target key end

     0   :  { %10 = vsyncpa [#allocation7], 0  ;;  %s583_s0 = inlined_call_operand.hbm [shape: f32[2], index: 0, kind: input, shape index: {}]   ;;  %s584_s1 = inlined_call_operand.hbm [shape: f32[8,128], index: 1, kind: input, shape index: {}]   ;;  %s585_s2 = inlined_call_operand.hbm [shape: f32[8,128], index: 2, kind: input, shape index: {}]   ;;  %s586_s3 = inlined_call_operand.vmem [shape: f32[8,128], index: 3, kind: input, shape index: {}]   ;;  %s587_s4 = inlined_call_operand.hbm [shape: f32[8,128], index: 4, kind: input, shape index: {}]   ;;  %s588_s5 = inlined_call_operand.hbm [shape: f32[1,1], index: 5, kind: output, shape index: {}]  }
   0x1   :  { %11 = vsyncpa [#allocation5], 0 }
   0x2   :  { %12 = vsyncpa [#allocation10], 0 }
   0x3   :  { %13 = vsyncpa [#allocation6], 0  ;;  %s475_s18 = smov [#allocation9]   ;;  %s476_s20 = smov [#allocation8]  }
   0x4   :  { %s38_s19 = sshll.u32 %s475_s18, 4  ;;  %s28_s21 = sshll.u32 %s476_s20, 4  ;;  %s39_s19 = int_to_ptr.vmem [resolvable:$true] %s38_s19  ;;  %s29_s21 = int_to_ptr.vmem [resolvable:$true] %s28_s21 }
   0x5   :  { %s369_s24 = scalar_lea.hbm %s585_s2, 128 }
   0x6   :  { %p370_p0 = scmp.ne.s32.totalorder %s585_s2, %s369_s24  ;;  %p373_p1 = scmp.lt.u32.totalorder %s369_s24, %s585_s2 }
   0x8   :  { %p375_p2 = pnand %p373_p1, %p370_p0 }
   0xa   :  { %378 = shalt.err (!%p375_p2)
}
   0xb   :  { %s379_s29 = scalar_lea.vmem %s39_s19, 128  ;;  %p384_p4 = scmp.lt.s32.totalorder %s39_s19, %s39_s19 }
   0xc   :  { %p380_p3 = scmp.ne.s32.totalorder %s39_s19, %s379_s29  ;;  %p385_p5 = scmp.lt.s32.totalorder %s379_s29, %s379_s29 }
   0xe   :  { %p386_p6 = por %p385_p5, %p384_p4 }
  0x10   :  { %p387_p7 = pnand %p386_p6, %p380_p3 }
  0x12   :  { %390 = shalt.err (!%p387_p7)
}
  0x13   :  { %41 = dma.hbm_to_vmem [thread:$0]  %s585_s2, 128, %s39_s19, [#allocation10]  }
  0x14   :  { %s391_s9 = scalar_lea.hbm %s583_s0, 16 }
  0x15   :  { %p392_p8 = scmp.ne.s32.totalorder %s583_s0, %s391_s9  ;;  %p395_p9 = scmp.lt.u32.totalorder %s391_s9, %s583_s0 }
  0x17   :  { %p397_p10 = pnand %p395_p9, %p392_p8 }
  0x19   :  { %400 = shalt.err (!%p397_p10)
}
  0x1a   :  { %s477_s14 = smov [#allocation4]   ;;  %s401_s18 = scalar_lea.hbm %s584_s1, 128 }
  0x1b   :  { %21 = dma.hbm_to_smem %s583_s0, 16, %s477_s14, [#allocation7]  }
  0x1c   :  { %p402_p11 = scmp.ne.s32.totalorder %s584_s1, %s401_s18  ;;  %p405_p12 = scmp.lt.u32.totalorder %s401_s18, %s584_s1 }
  0x1e   :  { %p407_p13 = pnand %p405_p12, %p402_p11 }
  0x20   :  { %410 = shalt.err (!%p407_p13)
}
  0x21   :  { %s411_s24 = scalar_lea.vmem %s29_s21, 128  ;;  %p416_p1 = scmp.lt.s32.totalorder %s29_s21, %s29_s21 }
  0x22   :  { %p412_p0 = scmp.ne.s32.totalorder %s29_s21, %s411_s24  ;;  %p417_p2 = scmp.lt.s32.totalorder %s411_s24, %s411_s24 }
  0x24   :  { %p418_p3 = por %p417_p2, %p416_p1 }
  0x26   :  { %p419_p4 = pnand %p418_p3, %p412_p0 }
  0x28   :  { %422 = shalt.err (!%p419_p4)
}
  0x29   :  { %31 = dma.hbm_to_vmem [thread:$0]  %s584_s1, 128, %s29_s21, [#allocation5]  }
  0x2a   :  { %s478_s26 = smov [#allocation11]   ;;  %s423_s30 = scalar_lea.hbm %s587_s4, 128 }
  0x2b   :  { %s50_s27 = sshll.u32 %s478_s26, 4  ;;  %p424_p5 = scmp.ne.s32.totalorder %s587_s4, %s423_s30  ;;  %s51_s27 = int_to_ptr.vmem [resolvable:$true] %s50_s27 }
  0x2c   :  { %p427_p6 = scmp.lt.u32.totalorder %s423_s30, %s587_s4 }
  0x2e   :  { %p429_p7 = pnand %p427_p6, %p424_p5 }
  0x30   :  { %432 = shalt.err (!%p429_p7)
}
  0x31   :  { %s433_s10 = scalar_lea.vmem %s51_s27, 128  ;;  %p438_p9 = scmp.lt.s32.totalorder %s51_s27, %s51_s27 }
  0x32   :  { %p434_p8 = scmp.ne.s32.totalorder %s51_s27, %s433_s10  ;;  %p439_p10 = scmp.lt.s32.totalorder %s433_s10, %s433_s10 }
  0x34   :  { %p440_p11 = por %p439_p10, %p438_p9 }
  0x36   :  { %p441_p12 = pnand %p440_p11, %p434_p8 }
  0x38   :  { %444 = shalt.err (!%p441_p12)
}
  0x39   :  { %53 = dma.hbm_to_vmem [thread:$0]  %s587_s4, 128, %s51_s27, [#allocation10]  }
  0x3a   :  { %467 = dma.done.wait [#allocation7], 16  }
  0x3b   :  { %468 = vsyncadd [#allocation7], 4294967280 }
  0x3c   :  { %469 = dma.done.wait [#allocation5], 128  }
  0x3d   :  { %470 = vsyncadd [#allocation5], 4294967168 }
  0x3e   :  { %471 = dma.done.wait [#allocation10], 256  }
  0x3f   :  { %472 = vsyncadd [#allocation10], 4294967040 }
  0x40   :  { %66 = sfence }
  0x41   :  { %v82_v0 = vld [vmem:[#allocation8] sm:$0xff]  ;;  %v83_v1 = vld [vmem:[#allocation9] sm:$0xff]  ;;  %v479_v5 = vmov 0.0   ;;  %v78_v6 = vld [vmem:[#allocation11] sm:$0xff]  ;;  %vm480_vm0 = vmmov 0   ;;  %v481_v11 = vmov 1.0   ;;  %v273_v31 = vlaneseq }
  0x42   :  { %v77_v2 = vld [vmem:[%s586_s3] sm:$0xff]  ;;  %v84_v3 = vsub.f32 %v82_v0, %v83_v1  ;;  %343 = vmatprep.subr.mxu1 %v479_v5  ;;  %338 = vmatprep.subr.mxu0 %v479_v5  ;;  %v202_v8 = vmul.f32 %v78_v6, %v78_v6  ;;  %v482_v12 = vmov 0   ;;  %s75_s3 = sld [smem:[#allocation4]]  ;;  %vm106_vm1 = vcmask 7168   ;;  %s333_s4 = sld [smem:[#allocation4 + $0x1]] }
  0x43   :  { %v95_v4 = vsub.f32 %v82_v0, %v77_v2  ;;  %v199_v7 = vmul.f32 %v77_v2, %v77_v2  ;;  %339 = vmatpush3.xpose.msra.mxu0 %v78_v6  ;;  %345 = vmatprep.mubr.msk.f32.mxu1 %vm480_vm0, %v479_v5  ;;  %vm73_vm6 = vcmask 0   ;;  %v274_v32 = vshrl.u32 %v273_v31, 7  ;;  %s483_s15 = smov [#allocation12]  }
  0x44   :  { %v85_v9 = vmul.f32 %v84_v3, %v84_v3  ;;  %340 = vmatprep.mubr.msk.f32.mxu0 %vm480_vm0, %v479_v5  ;;  %344 = vmatpush3.xpose.msra.mxu1 %v202_v8  ;;  %74 = vst.msk [vmem:[#allocation2] sm:$0x1] %vm73_vm6, %v479_v5  ;;  %vm298_vm9 = vcmask 64512   ;;  %s322_s16 = sshll.u32 %s483_s15, 4  ;;  %s323_s16 = int_to_ptr.vmem [resolvable:$true] %s322_s16 }
  0x45   :  { %200 = vadd.xlane.f32.xlu1 %v199_v7  ;;  %v96_v10 = vmul.f32 %v95_v4, %v95_v4  ;;  %362 = vset.pattern.permute.xlu0 %v482_v12  ;;  %v275_v33 = vsub.s32 0, %v274_v32  ;;  %s445_s2 = scalar_lea.vmem %s323_s16, 16  ;;  %s449_s17 = scalar_lea.vmem %s323_s16, 32 }
  0x46   :  { %86 = vadd.xlane.f32.xlu0 %v85_v9  ;;  %341 = vmatmul.mubr.f32.vlgmr.msra.gmra.mrb[0].mxu0 %v77_v2  ;;  %p446_p13 = scmp.ne.s32.totalorder %s323_s16, %s445_s2  ;;  %p450_p0 = scmp.lt.s32.totalorder %s323_s16, %s323_s16 }
  0x47   :  { %346 = vmatmul.mubr.f32.vlgmr.msra.gmra.mrb[0].mxu1 %v481_v11  ;;  %361 = vset.pattern.permute.xlu1 %v482_v12  ;;  %p451_p1 = scmp.lt.s32.totalorder %s449_s17, %s445_s2 }
  0x48   :  { %v109_v25 = vstv %s75_s3  ;;  %v294_v50 = vstv %s333_s4 }
  0x49   :  { %p452_p2 = por %p451_p1, %p450_p0 }
  0x4a   :  { %97 = vadd.xlane.f32.xlu0 %v96_v10 }
  0x4b   :  { %v112_v62 = vld [vmem:[#allocation2] sm:$0x1]  ;;  %p453_p3 = pnand %p452_p2, %p446_p13 }
  0xd2   :  { %v201_v37 = vpop.xlane.xlu1 %200 }
  0xd3   :  { %v87_v13 = vpop.xlane.xlu0 %86 }
  0xd4   :  { %363 = vrsqrt.f32 %v87_v13  ;;  %vm90_vm2 = vcmp.eq.f32.partialorder %v87_v13, inf  ;;  %v93_v17 = vand.u32 2147483648, %v87_v13  ;;  %vm92_vm3 = vcmp.eq.f32.partialorder %v87_v13, 0.0 }
  0xd7   :  { %v98_v14 = vpop.xlane.xlu0 %97 }
  0xd8   :  { %365 = vrsqrt.f32 %v98_v14  ;;  %vm101_vm4 = vcmp.eq.f32.partialorder %v98_v14, inf  ;;  %v104_v21 = vand.u32 2147483648, %v98_v14  ;;  %vm103_vm5 = vcmp.eq.f32.partialorder %v98_v14, 0.0 }
  0xde   :  { %v364_v15 = vpop.eup %363 }
  0xdf   :  { %v89_v16 = vmul.f32 %v364_v15, %v87_v13 }
  0xe1   :  { %v91_v18 = vsel %vm90_vm2, %v87_v13, %v89_v16 }
  0xe2   :  { %v366_v19 = vpop.eup %365  ;;  %v94_v20 = vsel %vm92_vm3, %v93_v17, %v91_v18 }
  0xe3   :  { %107 = vst.msk [vmem:[#allocation3] sm:$0xff] %vm106_vm1, %v94_v20  ;;  %v100_v22 = vmul.f32 %v366_v19, %v98_v14 }
  0xe5   :  { %v102_v23 = vsel %vm101_vm4, %v98_v14, %v100_v22 }
  0xe6   :  { %v105_v24 = vsel %vm103_vm5, %v104_v21, %v102_v23 }
  0xe7   :  { %v108_v26 = vsub.f32 %v94_v20, %v105_v24 }
  0xe9   :  { %v110_v27 = vadd.f32 %v109_v25, %v108_v26 }
  0xea   :  { %v128_v28 = vld [vmem:[#allocation3] sm:$0xff] }
  0xeb   :  { %290 = vperm.xlu1 %361, %v128_v28   ;;  %v111_v29 = vmax.f32 %v110_v27, 0.0 }
  0xed   :  { %v113_v30 = vsel %vm106_vm1, %v111_v29, 0.0 }
  0xee   :  { %114 = vadd.xlane.f32.xlu0 %v113_v30 }
 0x119   :  { %v195_v34 = vpop.f32.mrb[0].mxu0 }
 0x11a   :  { %v342_v35 = vpop.f32.mrb[1].mxu0  ;;  %v269_v36 = vpop.f32.mrb[0].mxu1  ;;  %v278_v39 = vmul.f32 2.0, %v195_v34 }
 0x11b   :  { %v276_v38 = vrot.slane %v269_v36, %v275_v33  ;;  %v347_v40 = vpop.f32.mrb[1].mxu1 }
 0x11d   :  { %v277_v41 = vadd.f32 %v276_v38, %v201_v37 }
 0x11f   :  { %v279_v42 = vsub.f32 %v277_v41, %v278_v39 }
 0x121   :  { %v280_v43 = vmax.f32 %v279_v42, 0.0 }
 0x123   :  { %367 = vrsqrt.f32 %v280_v43  ;;  %vm283_vm7 = vcmp.eq.f32.partialorder %v280_v43, inf  ;;  %v286_v46 = vand.u32 2147483648, %v280_v43  ;;  %vm285_vm8 = vcmp.eq.f32.partialorder %v280_v43, 0.0 }
 0x12d   :  { %v368_v44 = vpop.eup %367 }
 0x12e   :  { %v282_v45 = vmul.f32 %v368_v44, %v280_v43 }
 0x130   :  { %v284_v47 = vsel %vm283_vm7, %v280_v43, %v282_v45 }
 0x131   :  { %v287_v49 = vsel %vm285_vm8, %v286_v46, %v284_v47 }
 0x16a   :  { %v291_v48 = vpop.permute.xlu1 %290 }
 0x16b   :  { %v293_v51 = vsub.f32 %v291_v48, %v287_v49 }
 0x16d   :  { %v295_v52 = vadd.f32 %v294_v50, %v293_v51 }
 0x16f   :  { %v296_v53 = vmax.f32 %v295_v52, 0.0 }
 0x171   :  { %v299_v54 = vsel %vm298_vm9, %v296_v53, 0.0 }
 0x172   :  { %300 = vadd.xlane.f32.xlu0 %v299_v54 }
 0x17b   :  { %v115_v55 = vpop.xlane.xlu0 %114 }
 0x17c   :  { %v116_v56 = vrot.slane %v115_v55, 4 }
 0x17e   :  { %v117_v57 = vadd.f32 %v116_v56, %v115_v55 }
 0x180   :  { %v118_v58 = vrot.slane %v117_v57, 2 }
 0x182   :  { %v119_v59 = vadd.f32 %v118_v58, %v117_v57 }
 0x184   :  { %v120_v60 = vrot.slane %v119_v59, 1 }
 0x186   :  { %v121_v61 = vadd.f32 %v120_v60, %v119_v59 }
 0x188   :  { %348 = vpush %v121_v61 }
 0x1b9   :  { %s349_s13 = spop %348 }
 0x1ba   :  { %v123_v63 = vstv %s349_s13 }
 0x1bb   :  { %v124_v0 = vmul.f32 0.125, %v123_v63 }
 0x1bd   :  { %v125_v1 = vadd.f32 %v124_v0, %v112_v62 }
 0x1bf   :  { %127 = vst.msk [vmem:[#allocation2] sm:$0x1] %vm73_vm6, %v125_v1 }
 0x1c6   :  { %v297_v11 = vld [vmem:[#allocation2] sm:$0x1] }
 0x1ff   :  { %v301_v2 = vpop.xlane.xlu0 %300 }
 0x200   :  { %v302_v3 = vrot.slane %v301_v2, 4 }
 0x202   :  { %v303_v4 = vadd.f32 %v302_v3, %v301_v2 }
 0x204   :  { %v304_v5 = vrot.slane %v303_v4, 2 }
 0x206   :  { %v305_v6 = vadd.f32 %v304_v5, %v303_v4 }
 0x208   :  { %v306_v7 = vrot.slane %v305_v6, 1 }
 0x20a   :  { %v307_v8 = vadd.f32 %v306_v7, %v305_v6 }
 0x20c   :  { %350 = vpush %v307_v8 }
 0x23d   :  { %s351_s14 = spop %350 }
 0x23e   :  { %v309_v9 = vstv %s351_s14 }
 0x23f   :  { %v310_v10 = vmul.f32 0.015625, %v309_v9 }
 0x241   :  { %v311_v12 = vadd.f32 %v310_v10, %v297_v11 }
 0x243   :  { %313 = vst.msk [vmem:[#allocation2] sm:$0x1] %vm73_vm6, %v311_v12 }
 0x24a   :  { %v314_v13 = vld [vmem:[#allocation2] sm:$0x1] }
 0x24b   :  { %315 = vst.msk [vmem:[#allocation12] sm:$0x1] %vm73_vm6, %v314_v13 }
 0x24c   :  { %456 = shalt.err (!%p453_p3)
}
 0x24d   :  { %s457_s20 = scalar_lea.hbm %s588_s5, 16 }
 0x24e   :  { %p458_p4 = scmp.ne.s32.totalorder %s588_s5, %s457_s20  ;;  %p461_p5 = scmp.lt.u32.totalorder %s457_s20, %s588_s5 }
 0x250   :  { %p463_p6 = pnand %p461_p5, %p458_p4 }
 0x252   :  { %466 = shalt.err (!%p463_p6)
}
 0x253   :  { %325 = dma.vmem_to_hbm [thread:$0]  %s323_s16, 16, %s588_s5, [#allocation6]  }
 0x254   :  { %473 = dma.done.wait [#allocation6], 16  }
 0x255   :  { %474 = vsyncadd [#allocation6], 4294967280 }
 0x256   :  { %329 = vsyncpa [#allocation5], 1 }
 0x257   :  { %330 = vsyncpa [#allocation10], 1 }
 0x258   :  { %331 = vsyncpa [#allocation6], 1 }
 0x259   :  { %332 = vsyncpa [#allocation7], 1 }

</bundles_post_ra>
